<compile_context>
chip_gen: v5e
topology: v5e:2x2
jax: 0.10.0
libtpu: 0.0.40
codegen_flags: <defaults>
</compile_context>

<pallas_src>
import jax
import jax.numpy as jnp
from jax.experimental import pallas as pl
from jax.experimental.pallas import tpu as pltpu

NOISE_DIMENSION = 10
d = 1
hidden_dim = 16
GENERATOR_OUTPUT_IMAGE_SHAPE = 1

IN_DIM = NOISE_DIMENSION + d            # 11
OUT_DIM = GENERATOR_OUTPUT_IMAGE_SHAPE  # 1

# Max batch-tile (lanes per grid step). Per-tile VMEM (double-buffered, transposed
# layout) ~= 2*(64 + 32) bytes/row = 192*TB -> 3 MiB at 16K, safe on v5e/v6e/v7x.
TB_MAX = 16384


def _round_up(n, m):
    return (n + m - 1) // m * m


def _geny_x_kernel(x_ref, w1t_ref, b1_ref, w2_ref, b2_ref, o_ref):
    # x:   (IN_DIM, TB)      batch on lane axis
    # w1t: (hidden, IN_DIM)  = W1^T
    # b1:  (hidden, 1)
    # w2:  (hidden, OUT_DIM) = (16, 1)
    # b2:  (1, 1) in SMEM
    # o:   (OUT_DIM, TB)
    x = x_ref[...]

    # Layer 1 on the MXU: (16, 11) @ (11, TB) -> (16, TB), f32 accumulate.
    h = jnp.dot(w1t_ref[...], x, preferred_element_type=jnp.float32) + b1_ref[...]

    # LeakyReLU(0.1) on the VPU.
    h = jnp.where(h > 0, h, 0.1 * h)

    # Layer 2 (K=16, M=1): VPU multiply + sublane reduce instead of a tiny matmul.
    y = jnp.sum(h * w2_ref[...], axis=0, keepdims=True) + b2_ref[0, 0]

    o_ref[...] = y.astype(o_ref.dtype)


def geny_x_forward(x, w1, b1, w2, b2, *, tb=None):
    """x: (B, 11); w1: (11, 16); b1: (16,); w2: (16, 1); b2: (1,). Returns (B, 1)."""
    B = x.shape[0]
    if tb is None:
        # Small batches only need one 128-lane tile; large batches get big tiles.
        tb = min(TB_MAX, _round_up(B, 128))
    B_pad = _round_up(B, tb)

    # Transpose so batch is the lane (last) axis; zero-pad to a tile multiple.
    x_t = x.T                                           # (IN_DIM, B)
    if B_pad != B:
        x_t = jnp.pad(x_t, ((0, 0), (0, B_pad - B)))    # (IN_DIM, B_pad)

    w1_t = w1.T                                         # (hidden, IN_DIM)
    b1_col = b1.reshape(hidden_dim, 1)                  # (hidden, 1)
    w2_col = w2.reshape(hidden_dim, OUT_DIM)            # (hidden, 1)
    b2_2d = b2.reshape(1, 1)                            # (1, 1) -> SMEM

    grid = (B_pad // tb,)

    y_t = pl.pallas_call(
        _geny_x_kernel,
        out_shape=jax.ShapeDtypeStruct((OUT_DIM, B_pad), x.dtype),
        grid=grid,
        in_specs=[
            pl.BlockSpec((IN_DIM, tb), lambda i: (0, i)),              # x tiles
            pl.BlockSpec((hidden_dim, IN_DIM), lambda i: (0, 0)),      # W1^T resident
            pl.BlockSpec((hidden_dim, 1), lambda i: (0, 0)),           # b1 resident
            pl.BlockSpec((hidden_dim, OUT_DIM), lambda i: (0, 0)),     # w2 resident
            pl.BlockSpec(memory_space=pltpu.MemorySpace.SMEM),         # b2 scalar
        ],
        out_specs=pl.BlockSpec((OUT_DIM, tb), lambda i: (0, i)),
        compiler_params=pltpu.CompilerParams(
            dimension_semantics=("parallel",),
            vmem_limit_bytes=32 * 1024 * 1024,
        ),
    )(x_t, w1_t, b1_col, w2_col, b2_2d)

    # Drop padded columns, return in the PyTorch (B, OUT_DIM) layout.
    return y_t[:, :B].T


def init_params(key):
    """Deterministic init mimicking PyTorch's default Linear init (uniform +-1/sqrt(fan_in))."""
    k1, k2, k3, k4 = jax.random.split(key, 4)
    bound1 = 1.0 / (IN_DIM ** 0.5)
    w1 = jax.random.uniform(k1, (IN_DIM, hidden_dim), jnp.float32, -bound1, bound1)
    b1 = jax.random.uniform(k2, (hidden_dim,), jnp.float32, -bound1, bound1)
    bound2 = 1.0 / (hidden_dim ** 0.5)
    w2 = jax.random.uniform(k3, (hidden_dim, OUT_DIM), jnp.float32, -bound2, bound2)
    b2 = jax.random.uniform(k4, (OUT_DIM,), jnp.float32, -bound2, bound2)
    return w1, b1, w2, b2


if __name__ == "__main__":
    key = jax.random.PRNGKey(0)
    kx, kp = jax.random.split(key)

    B = 8  # small example batch (pads to one 128-lane tile)
    x = jax.random.normal(kx, (B, IN_DIM), dtype=jnp.float32)  # noise(10) ++ cond(1)
    w1, b1, w2, b2 = init_params(kp)

    y = geny_x_forward(x, w1, b1, w2, b2)
    y = jax.block_until_ready(y)

    # Pure-JAX reference of the same forward pass (x @ W + b convention == torch x @ W.T + b).
    h_ref = x @ w1 + b1
    h_ref = jnp.where(h_ref > 0, h_ref, 0.1 * h_ref)
    y_ref = h_ref @ w2 + b2
    assert y.shape == (B, OUT_DIM)
    assert jnp.allclose(y, y_ref, atol=1e-5, rtol=1e-5)

    print("KERNEL_OK")
</pallas_src>

<mosaic_0001>
module attributes {stable_mosaic.version = 11 : i64} {
  func.func @_geny_x_kernel(%arg0: i32, %arg1: memref<11x128xf32, #tpu.memory_space<vmem>>, %arg2: memref<16x11xf32, #tpu.memory_space<vmem>>, %arg3: memref<16x1xf32, #tpu.memory_space<vmem>>, %arg4: memref<16x1xf32, #tpu.memory_space<vmem>>, %arg5: memref<1x1xf32, #tpu.memory_space<smem>>, %arg6: memref<1x128xf32, #tpu.memory_space<vmem>>) attributes {dimension_semantics = [#tpu.dimension_semantics<parallel>], iteration_bounds = array<i64: 1>, scalar_prefetch = 0 : i64, scratch_operands = 0 : i64, tpu.core_type = #tpu.core_type<tc>, window_params = [{transform_indices = @transform_0, window_bounds = array<i64: 11, 128>}, {pipeline_mode = #tpu.pipeline_mode<synchronous>, transform_indices = @transform_1, window_bounds = array<i64: 16, 11>}, {pipeline_mode = #tpu.pipeline_mode<synchronous>, transform_indices = @transform_2, window_bounds = array<i64: 16, 1>}, {pipeline_mode = #tpu.pipeline_mode<synchronous>, transform_indices = @transform_3, window_bounds = array<i64: 16, 1>}, {transform_indices = @transform_4, window_bounds = array<i64: 1, 1>}, {transform_indices = @transform_5, window_bounds = array<i64: 1, 128>}]} {
    %c0 = arith.constant 0 : index
    %c0_0 = arith.constant 0 : index
    %0 = vector.load %arg1[%c0, %c0_0] : memref<11x128xf32, #tpu.memory_space<vmem>>, vector<11x128xf32>
    %c0_1 = arith.constant 0 : index
    %c0_2 = arith.constant 0 : index
    %1 = vector.load %arg2[%c0_1, %c0_2] : memref<16x11xf32, #tpu.memory_space<vmem>>, vector<16x11xf32>
    %cst = arith.constant dense<0.000000e+00> : vector<16x128xf32>
    %2 = tpu.matmul %1, %0, %cst {dimension_numbers = #tpu.dot_dimension_numbers<[1], [0], [0], [1], [0, 0, 1, 1], [], []>} : vector<16x11xf32>, vector<11x128xf32>, vector<16x128xf32> -> vector<16x128xf32>
    %c0_3 = arith.constant 0 : index
    %c0_4 = arith.constant 0 : index
    %3 = vector.load %arg3[%c0_3, %c0_4] : memref<16x1xf32, #tpu.memory_space<vmem>>, vector<16x1xf32>
    %4 = vector.broadcast %3 : vector<16x1xf32> to vector<16x128xf32>
    %5 = arith.addf %2, %4 : vector<16x128xf32>
    %cst_5 = arith.constant 0.000000e+00 : f32
    %6 = vector.broadcast %cst_5 : f32 to vector<16x128xf32>
    %7 = arith.cmpf ogt, %5, %6 : vector<16x128xf32>
    %cst_6 = arith.constant 1.000000e-01 : f32
    %8 = vector.broadcast %cst_6 : f32 to vector<16x128xf32>
    %9 = arith.mulf %8, %5 : vector<16x128xf32>
    %10 = arith.select %7, %5, %9 : vector<16x128xi1>, vector<16x128xf32>
    %c0_7 = arith.constant 0 : index
    %c0_8 = arith.constant 0 : index
    %11 = vector.load %arg4[%c0_7, %c0_8] : memref<16x1xf32, #tpu.memory_space<vmem>>, vector<16x1xf32>
    %12 = vector.broadcast %11 : vector<16x1xf32> to vector<16x128xf32>
    %13 = arith.mulf %10, %12 : vector<16x128xf32>
    %cst_9 = arith.constant dense<0.000000e+00> : vector<128xf32>
    %14 = vector.multi_reduction <add>, %13, %cst_9 [0] : vector<16x128xf32> to vector<128xf32>
    %15 = vector.shape_cast %14 : vector<128xf32> to vector<1x128xf32>
    %c0_10 = arith.constant 0 : index
    %c0_11 = arith.constant 0 : index
    %16 = memref.load %arg5[%c0_10, %c0_11] : memref<1x1xf32, #tpu.memory_space<smem>>
    %17 = vector.broadcast %16 : f32 to vector<1x128xf32>
    %18 = arith.addf %15, %17 : vector<1x128xf32>
    %c0_12 = arith.constant 0 : index
    %c0_13 = arith.constant 0 : index
    %19 = vector.load %arg6[%c0_12, %c0_13] : memref<1x128xf32, #tpu.memory_space<vmem>>, vector<1x128xf32>
    tpu.vector_store %arg6[%c0_12, %c0_13], %18 {strides = array<i32>} : memref<1x128xf32, #tpu.memory_space<vmem>>, vector<1x128xf32>,
    return
  }
  func.func @transform_0(%arg0: i32) -> (i32, i32) {
    %c0_i32 = arith.constant 0 : i32
    %c0_i32_0 = arith.constant 0 : i32
    return %c0_i32, %arg0 : i32, i32
  }
  func.func @transform_1(%arg0: i32) -> (i32, i32) {
    %c0_i32 = arith.constant 0 : i32
    %c0_i32_0 = arith.constant 0 : i32
    %c0_i32_1 = arith.constant 0 : i32
    return %c0_i32, %c0_i32_0 : i32, i32
  }
  func.func @transform_2(%arg0: i32) -> (i32, i32) {
    %c0_i32 = arith.constant 0 : i32
    %c0_i32_0 = arith.constant 0 : i32
    %c0_i32_1 = arith.constant 0 : i32
    return %c0_i32, %c0_i32_0 : i32, i32
  }
  func.func @transform_3(%arg0: i32) -> (i32, i32) {
    %c0_i32 = arith.constant 0 : i32
    %c0_i32_0 = arith.constant 0 : i32
    %c0_i32_1 = arith.constant 0 : i32
    return %c0_i32, %c0_i32_0 : i32, i32
  }
  func.func @transform_4(%arg0: i32) -> (i32, i32) {
    %c0_i32 = arith.constant 0 : i32
    %c0_i32_0 = arith.constant 0 : i32
    %c0_i32_1 = arith.constant 0 : i32
    return %c0_i32, %c0_i32_0 : i32, i32
  }
  func.func @transform_5(%arg0: i32) -> (i32, i32) {
    %c0_i32 = arith.constant 0 : i32
    %c0_i32_0 = arith.constant 0 : i32
    return %c0_i32, %arg0 : i32, i32
  }
}

</mosaic_0001>

<bundles_post_ra>
// kernel: tpu_custom_call.1
= control target key start
LH: loop header
LB: loop body
LE: loop exit
PB: predicated region body
PF: predicated region fallthrough
CT: control target
= control target key end

     0   :  { %vm45_vm0 = vcmask 1042432   ;;  %v154_v3 = vmov 0   ;;  %vm38_vm1 = vcmask 89088   ;;  %s216_s0 = inlined_call_operand.vmem [shape: f32[11,128], index: 0, kind: input, shape index: {}]   ;;  %s217_s1 = inlined_call_operand.vmem [shape: f32[16,11], index: 1, kind: input, shape index: {}]   ;;  %s218_s2 = inlined_call_operand.vmem [shape: f32[16,1], index: 2, kind: input, shape index: {}]   ;;  %s219_s3 = inlined_call_operand.vmem [shape: f32[16,1], index: 3, kind: input, shape index: {}]   ;;  %s220_s4 = inlined_call_operand.<no memory space> [shape: f32[1,1], index: 4, kind: input, shape index: {}]   ;;  %s221_s5 = inlined_call_operand.hbm [shape: f32[1,128], index: 5, kind: output, shape index: {}]  }
   0x1   :  { %v23_v0 = vld [vmem:[%s216_s0 + $0x8] sm:$0x7]  ;;  %v26_v1 = vld [vmem:[%s218_s2] sm:$0xff]  ;;  %126 = vset.pattern.permute.xlu0 %v154_v3 }
   0x2   :  { %v22_v2 = vld [vmem:[%s216_s0] sm:$0xff]  ;;  %119 = vmatpush.msk.msra.mxu0 %vm45_vm0, %v23_v0  ;;  %122 = vmatpush.msk.msra.mxu1 %vm45_vm0, %v23_v0  ;;  %v25_v6 = vld [vmem:[%s217_s1 + $0x8] sm:$0xff] }
   0x3   :  { %v78_v4 = vld [vmem:[%s219_s3] sm:$0xff]  ;;  %30 = vperm.xlu0 %126, %v26_v1  }
   0x4   :  { %v24_v5 = vld [vmem:[%s217_s1] sm:$0xff] }
   0x5   :  { %11 = vsyncpa [#allocation4], 0  ;;  %127 = vset.pattern.permute.xlu1 %v154_v3  ;;  %64 = vmatpush.msra.mxu0 %v22_v2  ;;  %v27_v7 = vld [vmem:[%s218_s2 + $0x8] sm:$0xff]  ;;  %v100_v29 = vstv %s220_s4  ;;  %s110_s11 = sshll.u32 %s221_s5, 4  ;;  %s111_s11 = int_to_ptr.hbm [resolvable:$true] %s110_s11 }
   0x6   :  { %123 = vmatpush.msra.mxu1 %v22_v2  ;;  %82 = vperm.xlu1 %127, %v78_v4   ;;  %v79_v8 = vld [vmem:[%s219_s3 + $0x8] sm:$0xff]  ;;  %s155_s3 = smov [#allocation3]  }
   0x7   :  { %120 = vmatmul.msk.f32.vlgmr.msra.gmra.mxu0 %vm38_vm1, %v24_v5  ;;  %121 = vmatmul.msk.f32.vlgmr.msra.gmra.mxu1 %vm38_vm1, %v25_v6  ;;  %s108_s8 = sshll.u32 %s155_s3, 4  ;;  %s109_s8 = int_to_ptr.vmem [resolvable:$true] %s108_s8 }
   0xb   :  { %35 = vperm.xlu0 %126, %v27_v7  }
   0xe   :  { %87 = vperm.xlu1 %127, %v79_v8  }
  0x75   :  { %v31_v9 = vpop.permute.xlu0 %30 }
  0x78   :  { %v83_v10 = vpop.permute.xlu1 %82 }
  0x7d   :  { %v36_v11 = vpop.permute.xlu0 %35 }
  0x80   :  { %v88_v18 = vpop.permute.xlu1 %87 }
  0x84   :  { %v66_v12 = vpop.f32.mrf.mxu0  ;;  %v69_v13 = vpop.f32.mrf.mxu1 }
  0x85   :  { %v67_v14 = vadd.f32 %v66_v12, %v31_v9  ;;  %v70_v15 = vadd.f32 %v69_v13, %v36_v11 }
  0x87   :  { %vm72_vm2 = vcmp.gt.f32.partialorder %v67_v14, 0.0  ;;  %v74_v16 = vmul.f32 0.1, %v67_v14  ;;  %vm73_vm3 = vcmp.gt.f32.partialorder %v70_v15, 0.0  ;;  %v75_v17 = vmul.f32 0.1, %v70_v15 }
  0x89   :  { %v76_v19 = vsel %vm72_vm2, %v67_v14, %v74_v16  ;;  %v77_v20 = vsel %vm73_vm3, %v70_v15, %v75_v17 }
  0x8a   :  { %v90_v21 = vmul.f32 %v83_v10, %v76_v19  ;;  %v91_v22 = vmul.f32 %v88_v18, %v77_v20 }
  0x8c   :  { %v92_v23 = vadd.f32 %v91_v22, %v90_v21 }
  0x8e   :  { %v93_v24 = vrot.slane %v92_v23, 4 }
  0x90   :  { %v94_v25 = vadd.f32 %v93_v24, %v92_v23 }
  0x92   :  { %v95_v26 = vrot.slane %v94_v25, 2 }
  0x94   :  { %v96_v27 = vadd.f32 %v95_v26, %v94_v25 }
  0x96   :  { %v97_v28 = vrot.slane %v96_v27, 1 }
  0x98   :  { %v98_v30 = vadd.f32 %v97_v28, %v96_v27 }
  0x9a   :  { %v101_v31 = vadd.f32 %v100_v29, %v98_v30 }
  0x9c   :  { %102 = vst [vmem:[#allocation3] sm:$0x1] %v101_v31 }
  0x9d   :  { %113 = dma.vmem_to_hbm [thread:$0]  %s109_s8, 16, %s111_s11, [#allocation4]  }
  0x9e   :  { %152 = dma.done.wait [#allocation4], 16  }
  0x9f   :  { %153 = vsyncadd [#allocation4], 4294967280 }
  0xa0   :  { %118 = vsyncpa [#allocation4], 1 }

</bundles_post_ra>
